<compile_context>
chip_gen: v6e
topology: v6e:2x2x1
jax: 0.10.0
libtpu: 0.0.40
codegen_flags: <defaults>
</compile_context>

<pallas_src>
import jax
import jax.numpy as jnp
from jax import lax
from jax.experimental import pallas as pl
from jax.experimental.pallas import tpu as pltpu

_BN_EPS = 1e-5
_MAX_SAMPLES_PER_BLOCK = 32  # keeps the static in-kernel unrolled loop short


def _vmem_capacity_bytes():
    """Physical VMEM of the local chip; conservative (v7x) fallback."""
    try:
        info = pltpu.get_tpu_info()
        cap = getattr(info, "vmem_capacity_bytes", None)
        if cap:
            return int(cap)
    except Exception:
        pass
    return 64 << 20


def _pick_block(n, c_in, c_out, hw_pad, x_itemsize, o_itemsize, vmem_limit):
    """Choose (samples-per-block nb, pixel tile t).

    t is the largest multiple of 128 that divides hw_pad and keeps one
    (x block + out block) pair within the byte budget; if the whole padded
    spatial extent fits, nb samples are batched per block instead.
    """
    per_col = c_in * x_itemsize + c_out * o_itemsize        # bytes / pixel column
    # One in+out pair; the pipeline double-buffers it, and past a few MiB the
    # HBM roofline is already saturated, so cap the pair at 8 MiB.
    pair_budget = min(int(vmem_limit * 0.35), 8 << 20)
    max_cols = max(128, pair_budget // per_col)              # pixel columns allowed

    k = hw_pad // 128
    d = max(1, min(k, max_cols // 128))
    while k % d:                                             # largest divisor of k <= d
        d -= 1
    t = 128 * d

    nb = 1
    if t == hw_pad and n > 1:
        nb = int(min(n, _MAX_SAMPLES_PER_BLOCK, max(1, max_cols // hw_pad)))
        while n % nb:                                        # nb must divide n
            nb -= 1
    return nb, t


def _stats_kernel(x_ref, sumx_ref, gram_ref):
    # x_ref:    (nb, C_in, T)   nb samples x one pixel tile (pixels on lanes)
    # sumx_ref: (C_in, 1)       running per-channel sum over pixels
    # gram_ref: (C_in, C_in)    running Gram matrix  X X^T
    @pl.when(pl.program_id(2) == 0)
    def _():
        sumx_ref[...] = jnp.zeros_like(sumx_ref)
        gram_ref[...] = jnp.zeros_like(gram_ref)

    nb = x_ref.shape[0]
    for b in range(nb):                       # static, short unrolled loop
        xb = x_ref[b]                         # (C_in, T), native dtype
        # Cross-lane sum on the XLU (free slot in this HBM-bound pass).
        sumx_ref[...] += jnp.sum(xb.astype(jnp.float32), axis=1, keepdims=True)
        # Contract over the pixel (lane) axis of both operands -> (C_in, C_in);
        # MXU with f32 accumulation (native bf16 path when the input is bf16).
        gram_ref[...] += lax.dot_general(
            xb, xb, (((1,), (1,)), ((), ())), preferred_element_type=jnp.float32
        )


def _apply_kernel(x_ref, w_ref, b_ref, o_ref):
    # x_ref: (nb, C_in, T); w_ref: (C_out, C_in) BN-folded weight (x's dtype
    # when bf16); b_ref: (C_out, 1) f32 bias; o_ref: (nb, C_out, T) lane-dense.
    nb = x_ref.shape[0]
    w = w_ref[...]
    bias = b_ref[...]
    for b in range(nb):
        y = jnp.dot(w, x_ref[b], preferred_element_type=jnp.float32) + bias
        o_ref[b] = y.astype(o_ref.dtype)


def mapping_forward(x_nchw, conv_weight, bn_gamma, bn_beta):
    """Forward of `Mapping`.

    x_nchw:      (N, C_in, H, W)
    conv_weight: (C_out, C_in, 1, 1)   (PyTorch Conv2d weight layout)
    bn_gamma:    (C_out,)
    bn_beta:     (C_out,)
    returns:     (N, C_out, H, W)
    """
    n, c_in, h, w = x_nchw.shape
    c_out = conv_weight.shape[0]
    hw = h * w
    hw_pad = ((hw + 127) // 128) * 128

    # Pure reshape; zero-pad the pixel axis to a multiple of 128 so every lane
    # tile is dense (zeros contribute nothing to sum/Gram; output pad dropped).
    x3d = x_nchw.reshape(n, c_in, hw)
    if hw_pad != hw:
        x3d = jnp.pad(x3d, ((0, 0), (0, 0), (0, hw_pad - hw)))

    w2d = conv_weight.reshape(c_out, c_in).astype(jnp.float32)

    x_itemsize = x_nchw.dtype.itemsize
    cap = _vmem_capacity_bytes()
    vmem_limit = max(32 << 20, min((cap * 3) // 4, 96 << 20))  # 48 MiB on v7x, 96 on v5e/v6e

    nb, t = _pick_block(n, c_in, c_out, hw_pad, x_itemsize, x_itemsize, vmem_limit)
    n_groups = n // nb
    n_tiles = hw_pad // t
    # Keep both v7x TensorCores busy in pass 1 even when N is small: split the
    # pixel-tile axis into a 2-way "parallel" outer axis when possible.
    n_split = 2 if (n_tiles >= 2 and n_tiles % 2 == 0) else 1
    n_inner = n_tiles // n_split

    # ---------------- pass 1: streaming statistics of x ----------------
    sumx_part, gram_part = pl.pallas_call(
        _stats_kernel,
        grid=(n_groups, n_split, n_inner),
        out_shape=(
            jax.ShapeDtypeStruct((n_groups, n_split, c_in, 1), jnp.float32),
            jax.ShapeDtypeStruct((n_groups, n_split, c_in, c_in), jnp.float32),
        ),
        in_specs=[
            pl.BlockSpec((nb, c_in, t), lambda g, s, p: (g, 0, s * n_inner + p)),
        ],
        out_specs=(
            pl.BlockSpec((pl.Squeezed(), pl.Squeezed(), c_in, 1),
                         lambda g, s, p: (g, s, 0, 0)),
            pl.BlockSpec((pl.Squeezed(), pl.Squeezed(), c_in, c_in),
                         lambda g, s, p: (g, s, 0, 0)),
        ),
        compiler_params=pltpu.CompilerParams(
            dimension_semantics=("parallel", "parallel", "arbitrary"),
            vmem_limit_bytes=vmem_limit,
        ),
    )(x3d)

    # ------------- tiny fold of BN into the conv weight (pure JAX) -------------
    m = n * hw                                                   # real pixel count
    sum_x = jnp.sum(sumx_part, axis=(0, 1))                      # (C_in, 1)
    gram = jnp.sum(gram_part, axis=(0, 1))                       # (C_in, C_in)
    mean_x = sum_x / m
    cov_x = gram / m - mean_x @ mean_x.T
    mean_y = w2d @ mean_x                                        # (C_out, 1)
    var_y = jnp.sum((w2d @ cov_x) * w2d, axis=1, keepdims=True)  # biased variance
    var_y = jnp.maximum(var_y, 0.0)                              # cancellation guard
    scale = bn_gamma.astype(jnp.float32).reshape(c_out, 1) * lax.rsqrt(var_y + _BN_EPS)
    w_fold = scale * w2d                                         # (C_out, C_in)
    bias = bn_beta.astype(jnp.float32).reshape(c_out, 1) - scale * mean_y

    # Native bf16 MXU path when the activations are bf16; f32 otherwise.
    w_apply = w_fold.astype(jnp.bfloat16) if x_nchw.dtype == jnp.bfloat16 else w_fold

    # ---------------- pass 2: fused conv + BN, written once ----------------
    out3d = pl.pallas_call(
        _apply_kernel,
        grid=(n_groups, n_tiles),
        out_shape=jax.ShapeDtypeStruct((n, c_out, hw_pad), x_nchw.dtype),
        in_specs=[
            pl.BlockSpec((nb, c_in, t), lambda g, p: (g, 0, p)),
            pl.BlockSpec((c_out, c_in), lambda g, p: (0, 0)),
            pl.BlockSpec((c_out, 1), lambda g, p: (0, 0)),
        ],
        out_specs=pl.BlockSpec((nb, c_out, t), lambda g, p: (g, 0, p)),
        compiler_params=pltpu.CompilerParams(
            dimension_semantics=("parallel", "parallel"),
            vmem_limit_bytes=vmem_limit,
        ),
    )(x3d, w_apply, bias)

    if hw_pad != hw:
        out3d = out3d[:, :, :hw]
    return out3d.reshape(n, c_out, h, w)


def _reference_forward(x_nchw, conv_weight, bn_gamma, bn_beta):
    """Pure-JAX reference (Conv2d 1x1 no bias + BatchNorm2d training-mode forward)."""
    n, c_in, h, w = x_nchw.shape
    c_out = conv_weight.shape[0]
    x2d = jnp.transpose(x_nchw, (0, 2, 3, 1)).reshape(-1, c_in).astype(jnp.float32)
    w2d = conv_weight.reshape(c_out, c_in).astype(jnp.float32).T
    y = x2d @ w2d
    mean = y.mean(axis=0, keepdims=True)
    var = ((y - mean) ** 2).mean(axis=0, keepdims=True)
    y = (y - mean) / jnp.sqrt(var + _BN_EPS) * bn_gamma[None, :] + bn_beta[None, :]
    return jnp.transpose(y.reshape(n, h, w, c_out), (0, 3, 1, 2))


if __name__ == "__main__":
    key = jax.random.PRNGKey(0)
    k_x, k_w = jax.random.split(key)

    N, C_IN, C_OUT, H, W = 2, 4, 8, 16, 16

    x = jax.random.normal(k_x, (N, C_IN, H, W), dtype=jnp.float32)

    # Deterministic synthetic parameters (PyTorch-like init; BN gamma=1, beta=0).
    fan_in = C_IN  # 1x1 kernel
    bound = 1.0 / (fan_in ** 0.5)
    conv_w = jax.random.uniform(
        k_w, (C_OUT, C_IN, 1, 1), minval=-bound, maxval=bound, dtype=jnp.float32
    )
    bn_gamma = jnp.ones((C_OUT,), dtype=jnp.float32)
    bn_beta = jnp.zeros((C_OUT,), dtype=jnp.float32)

    out = mapping_forward(x, conv_w, bn_gamma, bn_beta)
    out = jax.block_until_ready(out)

    ref = _reference_forward(x, conv_w, bn_gamma, bn_beta)
    assert out.shape == (N, C_OUT, H, W)
    assert jnp.allclose(out, ref, atol=1e-4, rtol=1e-4), "mismatch vs reference"

    print("KERNEL_OK")
</pallas_src>

<mosaic_0001>
module attributes {stable_mosaic.version = 11 : i64} {
  func.func @_stats_kernel(%arg0: i32, %arg1: i32, %arg2: i32, %arg3: memref<2x4x256xf32, #tpu.memory_space<vmem>>, %arg4: memref<1x1x4x1xf32, #tpu.memory_space<vmem>>, %arg5: memref<1x1x4x4xf32, #tpu.memory_space<vmem>>) attributes {dimension_semantics = [#tpu.dimension_semantics<parallel>, #tpu.dimension_semantics<parallel>, #tpu.dimension_semantics<arbitrary>], iteration_bounds = array<i64: 1, 1, 1>, scalar_prefetch = 0 : i64, scratch_operands = 0 : i64, tpu.core_type = #tpu.core_type<tc>, window_params = [{transform_indices = @transform_0, window_bounds = array<i64: 2, 4, 256>}, {transform_indices = @transform_1, window_bounds = array<i64: 1, 1, 4, 1>}, {transform_indices = @transform_2, window_bounds = array<i64: 1, 1, 4, 4>}]} {
    %c0_i32 = arith.constant 0 : i32
    %0 = arith.cmpi eq, %arg2, %c0_i32 : i32
    %1 = arith.extui %0 : i1 to i32
    %c0_i32_0 = arith.constant 0 : i32
    %2 = arith.cmpi ne, %1, %c0_i32_0 : i32
    scf.if %2 {
      %cst_40 = arith.constant 0.000000e+00 : f32
      %37 = vector.broadcast %cst_40 : f32 to vector<4x1xf32>
      %c0_41 = arith.constant 0 : index
      %c0_42 = arith.constant 0 : index
      %c0_43 = arith.constant 0 : index
      %c0_44 = arith.constant 0 : index
      %38 = vector.load %arg4[%c0_41, %c0_42, %c0_43, %c0_44] : memref<1x1x4x1xf32, #tpu.memory_space<vmem>>, vector<1x1x4x1xf32>
      %39 = vector.shape_cast %38 : vector<1x1x4x1xf32> to vector<4x1xf32>
      %40 = vector.shape_cast %37 : vector<4x1xf32> to vector<1x1x4x1xf32>
      tpu.vector_store %arg4[%c0_41, %c0_42, %c0_43, %c0_44], %40 {strides = array<i32>} : memref<1x1x4x1xf32, #tpu.memory_space<vmem>>, vector<1x1x4x1xf32>,
      %cst_45 = arith.constant 0.000000e+00 : f32
      %41 = vector.broadcast %cst_45 : f32 to vector<4x4xf32>
      %c0_46 = arith.constant 0 : index
      %c0_47 = arith.constant 0 : index
      %c0_48 = arith.constant 0 : index
      %c0_49 = arith.constant 0 : index
      %42 = vector.load %arg5[%c0_46, %c0_47, %c0_48, %c0_49] : memref<1x1x4x4xf32, #tpu.memory_space<vmem>>, vector<1x1x4x4xf32>
      %43 = vector.shape_cast %42 : vector<1x1x4x4xf32> to vector<4x4xf32>
      %44 = vector.shape_cast %41 : vector<4x4xf32> to vector<1x1x4x4xf32>
      tpu.vector_store %arg5[%c0_46, %c0_47, %c0_48, %c0_49], %44 {strides = array<i32>} : memref<1x1x4x4xf32, #tpu.memory_space<vmem>>, vector<1x1x4x4xf32>,
    } else {
    }
    %c0 = arith.constant 0 : index
    %c0_1 = arith.constant 0 : index
    %c0_2 = arith.constant 0 : index
    %3 = vector.load %arg3[%c0, %c0_1, %c0_2] : memref<2x4x256xf32, #tpu.memory_space<vmem>>, vector<1x4x256xf32>
    %4 = vector.shape_cast %3 : vector<1x4x256xf32> to vector<4x256xf32>
    %c0_3 = arith.constant 0 : index
    %c0_4 = arith.constant 0 : index
    %c0_5 = arith.constant 0 : index
    %c0_6 = arith.constant 0 : index
    %5 = vector.load %arg4[%c0_3, %c0_4, %c0_5, %c0_6] : memref<1x1x4x1xf32, #tpu.memory_space<vmem>>, vector<1x1x4x1xf32>
    %6 = vector.shape_cast %5 : vector<1x1x4x1xf32> to vector<4x1xf32>
    %cst = arith.constant dense<0.000000e+00> : vector<4xf32>
    %7 = vector.multi_reduction <add>, %4, %cst [1] : vector<4x256xf32> to vector<4xf32>
    %8 = vector.shape_cast %7 : vector<4xf32> to vector<4x1xf32>
    %9 = arith.addf %6, %8 : vector<4x1xf32>
    %c0_7 = arith.constant 0 : index
    %c0_8 = arith.constant 0 : index
    %c0_9 = arith.constant 0 : index
    %c0_10 = arith.constant 0 : index
    %10 = vector.load %arg4[%c0_7, %c0_8, %c0_9, %c0_10] : memref<1x1x4x1xf32, #tpu.memory_space<vmem>>, vector<1x1x4x1xf32>
    %11 = vector.shape_cast %10 : vector<1x1x4x1xf32> to vector<4x1xf32>
    %12 = vector.shape_cast %9 : vector<4x1xf32> to vector<1x1x4x1xf32>
    tpu.vector_store %arg4[%c0_7, %c0_8, %c0_9, %c0_10], %12 {strides = array<i32>} : memref<1x1x4x1xf32, #tpu.memory_space<vmem>>, vector<1x1x4x1xf32>,
    %c0_11 = arith.constant 0 : index
    %c0_12 = arith.constant 0 : index
    %c0_13 = arith.constant 0 : index
    %c0_14 = arith.constant 0 : index
    %13 = vector.load %arg5[%c0_11, %c0_12, %c0_13, %c0_14] : memref<1x1x4x4xf32, #tpu.memory_space<vmem>>, vector<1x1x4x4xf32>
    %14 = vector.shape_cast %13 : vector<1x1x4x4xf32> to vector<4x4xf32>
    %cst_15 = arith.constant dense<0.000000e+00> : vector<4x4xf32>
    %15 = tpu.matmul %4, %4, %cst_15 {dimension_numbers = #tpu.dot_dimension_numbers<[1], [1], [0], [0], [0, 0, 1, 0], [], []>} : vector<4x256xf32>, vector<4x256xf32>, vector<4x4xf32> -> vector<4x4xf32>
    %16 = arith.addf %14, %15 : vector<4x4xf32>
    %c0_16 = arith.constant 0 : index
    %c0_17 = arith.constant 0 : index
    %c0_18 = arith.constant 0 : index
    %c0_19 = arith.constant 0 : index
    %17 = vector.load %arg5[%c0_16, %c0_17, %c0_18, %c0_19] : memref<1x1x4x4xf32, #tpu.memory_space<vmem>>, vector<1x1x4x4xf32>
    %18 = vector.shape_cast %17 : vector<1x1x4x4xf32> to vector<4x4xf32>
    %19 = vector.shape_cast %16 : vector<4x4xf32> to vector<1x1x4x4xf32>
    tpu.vector_store %arg5[%c0_16, %c0_17, %c0_18, %c0_19], %19 {strides = array<i32>} : memref<1x1x4x4xf32, #tpu.memory_space<vmem>>, vector<1x1x4x4xf32>,
    %c1 = arith.constant 1 : index
    %c0_20 = arith.constant 0 : index
    %c0_21 = arith.constant 0 : index
    %20 = vector.load %arg3[%c1, %c0_20, %c0_21] : memref<2x4x256xf32, #tpu.memory_space<vmem>>, vector<1x4x256xf32>
    %21 = vector.shape_cast %20 : vector<1x4x256xf32> to vector<4x256xf32>
    %c0_22 = arith.constant 0 : index
    %c0_23 = arith.constant 0 : index
    %c0_24 = arith.constant 0 : index
    %c0_25 = arith.constant 0 : index
    %22 = vector.load %arg4[%c0_22, %c0_23, %c0_24, %c0_25] : memref<1x1x4x1xf32, #tpu.memory_space<vmem>>, vector<1x1x4x1xf32>
    %23 = vector.shape_cast %22 : vector<1x1x4x1xf32> to vector<4x1xf32>
    %cst_26 = arith.constant dense<0.000000e+00> : vector<4xf32>
    %24 = vector.multi_reduction <add>, %21, %cst_26 [1] : vector<4x256xf32> to vector<4xf32>
    %25 = vector.shape_cast %24 : vector<4xf32> to vector<4x1xf32>
    %26 = arith.addf %23, %25 : vector<4x1xf32>
    %c0_27 = arith.constant 0 : index
    %c0_28 = arith.constant 0 : index
    %c0_29 = arith.constant 0 : index
    %c0_30 = arith.constant 0 : index
    %27 = vector.load %arg4[%c0_27, %c0_28, %c0_29, %c0_30] : memref<1x1x4x1xf32, #tpu.memory_space<vmem>>, vector<1x1x4x1xf32>
    %28 = vector.shape_cast %27 : vector<1x1x4x1xf32> to vector<4x1xf32>
    %29 = vector.shape_cast %26 : vector<4x1xf32> to vector<1x1x4x1xf32>
    tpu.vector_store %arg4[%c0_27, %c0_28, %c0_29, %c0_30], %29 {strides = array<i32>} : memref<1x1x4x1xf32, #tpu.memory_space<vmem>>, vector<1x1x4x1xf32>,
    %c0_31 = arith.constant 0 : index
    %c0_32 = arith.constant 0 : index
    %c0_33 = arith.constant 0 : index
    %c0_34 = arith.constant 0 : index
    %30 = vector.load %arg5[%c0_31, %c0_32, %c0_33, %c0_34] : memref<1x1x4x4xf32, #tpu.memory_space<vmem>>, vector<1x1x4x4xf32>
    %31 = vector.shape_cast %30 : vector<1x1x4x4xf32> to vector<4x4xf32>
    %cst_35 = arith.constant dense<0.000000e+00> : vector<4x4xf32>
    %32 = tpu.matmul %21, %21, %cst_35 {dimension_numbers = #tpu.dot_dimension_numbers<[1], [1], [0], [0], [0, 0, 1, 0], [], []>} : vector<4x256xf32>, vector<4x256xf32>, vector<4x4xf32> -> vector<4x4xf32>
    %33 = arith.addf %31, %32 : vector<4x4xf32>
    %c0_36 = arith.constant 0 : index
    %c0_37 = arith.constant 0 : index
    %c0_38 = arith.constant 0 : index
    %c0_39 = arith.constant 0 : index
    %34 = vector.load %arg5[%c0_36, %c0_37, %c0_38, %c0_39] : memref<1x1x4x4xf32, #tpu.memory_space<vmem>>, vector<1x1x4x4xf32>
    %35 = vector.shape_cast %34 : vector<1x1x4x4xf32> to vector<4x4xf32>
    %36 = vector.shape_cast %33 : vector<4x4xf32> to vector<1x1x4x4xf32>
    tpu.vector_store %arg5[%c0_36, %c0_37, %c0_38, %c0_39], %36 {strides = array<i32>} : memref<1x1x4x4xf32, #tpu.memory_space<vmem>>, vector<1x1x4x4xf32>,
    return
  }
  func.func @transform_0(%arg0: i32, %arg1: i32, %arg2: i32) -> (i32, i32, i32) {
    %c1_i32 = arith.constant 1 : i32
    %0 = arith.muli %arg1, %c1_i32 : i32
    %1 = arith.addi %0, %arg2 : i32
    %c0_i32 = arith.constant 0 : i32
    %c0_i32_0 = arith.constant 0 : i32
    return %arg0, %c0_i32, %1 : i32, i32, i32
  }
  func.func @transform_1(%arg0: i32, %arg1: i32, %arg2: i32) -> (i32, i32, i32, i32) {
    %c0_i32 = arith.constant 0 : i32
    %c0_i32_0 = arith.constant 0 : i32
    %c0_i32_1 = arith.constant 0 : i32
    return %arg0, %arg1, %c0_i32, %c0_i32_0 : i32, i32, i32, i32
  }
  func.func @transform_2(%arg0: i32, %arg1: i32, %arg2: i32) -> (i32, i32, i32, i32) {
    %c0_i32 = arith.constant 0 : i32
    %c0_i32_0 = arith.constant 0 : i32
    %c0_i32_1 = arith.constant 0 : i32
    return %arg0, %arg1, %c0_i32, %c0_i32_0 : i32, i32, i32, i32
  }
}

</mosaic_0001>

<bundles_post_ra>
// kernel: tpu_custom_call.1
= control target key start
LH: loop header
LB: loop body
LE: loop exit
PB: predicated region body
PF: predicated region fallthrough
CT: control target
= control target key end

     0   :  { %8 = vsyncpa [#allocation3], 0  ;;  %s327_s0 = inlined_call_operand.hbm [shape: f32[2,4,256], index: 0, kind: input, shape index: {}]   ;;  %s328_s1 = inlined_call_operand.vmem [shape: f32[1,1,4,1], index: 1, kind: output, shape index: {0}]   ;;  %s329_s2 = inlined_call_operand.hbm [shape: f32[1,1,4,4], index: 2, kind: output, shape index: {1}]  }
   0x1   :  { %9 = vsyncpa [#allocation4], 0  ;;  %s283_s9 = smov [#allocation2]  }
   0x2   :  { %s19_s10 = sshll.u32 %s283_s9, 4  ;;  %s20_s10 = int_to_ptr.vmem [resolvable:$true] %s19_s10 }
   0x3   :  { %s247_s11 = scalar_lea.vmem %s20_s10, 256  ;;  %p252_p1 = scmp.lt.s32.totalorder %s20_s10, %s20_s10 }
   0x4   :  { %p248_p0 = scmp.ne.s32.totalorder %s20_s10, %s247_s11  ;;  %p253_p2 = scmp.lt.s32.totalorder %s247_s11, %s247_s11 }
   0x6   :  { %p254_p3 = por %p253_p2, %p252_p1 }
   0x8   :  { %p255_p4 = pnand %p254_p3, %p248_p0 }
   0xa   :  { %258 = shalt.err (!%p255_p4)
}
   0xb   :  { %s284_s12 = smov 128   ;;  %s285_s13 = smov 8  }
   0xc   :  { %25 = dma.hbm_to_vmem [thread:$0]  %s327_s0, 256, %s20_s10, [#allocation3], %s284_s12, %s284_s12, %s285_s13  }
   0xd   :  { %279 = dma.done.wait [#allocation3], 256  }
   0xe   :  { %280 = vsyncadd [#allocation3], 4294967040  ;;  %vm37_vm0 = vcmask 27648   ;;  %v286_v0 = vmov 0.0   ;;  %vm44_vm1 = vcmask 1043456   ;;  %v39_v1 = vld [vmem:[#allocation2] sm:$0xff] }
   0xf   :  { %38 = vst.msk [vmem:[#allocation5] sm:$0xf] %vm37_vm0, %v286_v0  ;;  %v128_v2 = vld [vmem:[#allocation2 + $0x8] sm:$0xff]  ;;  %v42_v3 = vcombine.high %v39_v1, %v39_v1  ;;  %v45_v5 = vsel %vm44_vm1, %v39_v1, 0.0  ;;  %vm35_vm2 = vcmask 3072   ;;  %s287_s25 = smov [#allocation5]  }
  0x10   :  { %v131_v4 = vcombine.high %v128_v2, %v128_v2  ;;  %v133_v7 = vsel %vm44_vm1, %v128_v2, 0.0  ;;  %36 = vst.msk [vmem:[%s328_s1] sm:$0xf] %vm35_vm2, %v286_v0  ;;  %s221_s26 = sshll.u32 %s287_s25, 4  ;;  %s222_s26 = int_to_ptr.vmem [resolvable:$true] %s221_s26 }
  0x11   :  { %84 = vmatprep.subr.mxu0 %v42_v3  ;;  %118 = vmatprep.mubr.f32.mxu0 %v42_v3  ;;  %v46_v6 = vsel %vm44_vm1, %v42_v3, 0.0  ;;  %s259_s27 = scalar_lea.vmem %s222_s26, 64  ;;  %p264_p6 = scmp.lt.s32.totalorder %s222_s26, %s222_s26 }
  0x12   :  { %v134_v8 = vsel %vm44_vm1, %v131_v4, 0.0  ;;  %85 = vmatpush1.xpose.msra.mxu0 %v39_v1  ;;  %171 = vmatprep.subr.mxu1 %v131_v4  ;;  %v47_v9 = vadd.f32 %v46_v6, %v45_v5  ;;  %p260_p5 = scmp.ne.s32.totalorder %s222_s26, %s259_s27  ;;  %p265_p7 = scmp.lt.s32.totalorder %s259_s27, %s259_s27 }
  0x13   :  { %172 = vmatpush1.xpose.msra.mxu1 %v128_v2  ;;  %205 = vmatprep.mubr.f32.mxu1 %v131_v4  ;;  %v135_v10 = vadd.f32 %v134_v8, %v133_v7 }
  0x14   :  { %48 = vadd.xlane.f32.xlu0 %v47_v9  ;;  %p266_p8 = por %p265_p7, %p264_p6 }
  0x15   :  { %119 = vmatmul.mubr.f32.vlgmr.msra.gmra.mxu0 %v39_v1 }
  0x16   :  { %206 = vmatmul.mubr.f32.vlgmr.msra.gmra.mxu1 %v128_v2  ;;  %v53_v17 = vld [vmem:[#allocation5] sm:$0xf]  ;;  %p267_p9 = pnand %p266_p8, %p260_p5 }
  0x17   :  { %v40_v11 = vld [vmem:[%s328_s1] sm:$0xf] }
  0x18   :  { %136 = vadd.xlane.f32.xlu0 %v135_v10 }
  0x9d   :  { %v49_v12 = vpop.xlane.xlu0 %48 }
  0x9e   :  { %v50_v13 = vadd.f32 %v49_v12, %v40_v11 }
  0xa0   :  { %52 = vst.msk [vmem:[%s328_s1] sm:$0xf] %vm35_vm2, %v50_v13 }
  0xa1   :  { %v137_v14 = vpop.xlane.xlu0 %136 }
  0xa7   :  { %v129_v15 = vld [vmem:[%s328_s1] sm:$0xf] }
  0xa8   :  { %v138_v16 = vadd.f32 %v137_v14, %v129_v15 }
  0xaa   :  { %139 = vst.msk [vmem:[%s328_s1] sm:$0xf] %vm35_vm2, %v138_v16 }
  0xd5   :  { %v120_v18 = vpop.f32.mrf.mxu0 }
  0xd6   :  { %v124_v19 = vadd.f32 %v120_v18, %v53_v17  ;;  %v207_v20 = vpop.f32.mrf.mxu1 }
  0xd7   :  { %v122_v21 = vpop.f32.mrf.mxu0 }
  0xd8   :  { %126 = vst.msk [vmem:[#allocation5] sm:$0xf] %vm37_vm0, %v124_v19  ;;  %v209_v22 = vpop.f32.mrf.mxu1 }
  0xdf   :  { %v140_v23 = vld [vmem:[#allocation5] sm:$0xf] }
  0xe0   :  { %v211_v24 = vadd.f32 %v207_v20, %v140_v23 }
  0xe2   :  { %212 = vst.msk [vmem:[#allocation5] sm:$0xf] %vm37_vm0, %v211_v24 }
  0xe3   :  { %270 = shalt.err (!%p267_p9)
}
  0xe4   :  { %224 = dma.vmem_to_hbm [thread:$0]  %s222_s26, 64, %s329_s2, [#allocation4]  }
  0xe5   :  { %281 = dma.done.wait [#allocation4], 64  }
  0xe6   :  { %282 = vsyncadd [#allocation4], 4294967232 }
  0xe7   :  { %230 = vsyncpa [#allocation3], 1 }
  0xe8   :  { %231 = vsyncpa [#allocation4], 1 }

</bundles_post_ra>
